<compile_context>
chip_gen: v7x
topology: tpu7x:2x2x1
jax: 0.10.0
libtpu: 0.0.40
codegen_flags: <defaults>
</compile_context>

<pallas_src>
import functools

import jax
import jax.numpy as jnp
from jax.experimental import pallas as pl
from jax.experimental.pallas import tpu as pltpu


def _gap_kernel(x_ref, o_ref, *, inv_spatial):
    # x_ref: (Bt, Ct, S) block.  Mean over the trailing (spatial) axis.
    x = x_ref[...].astype(jnp.float32)            # cast in-kernel (v5e-friendly)
    s = jnp.sum(x, axis=-1)                       # (Bt, Ct)
    o_ref[...] = (s * inv_spatial).astype(o_ref.dtype)


def _gap_single(x):
    """Global average pooling of one array (B, C, *spatial) -> (B, C)."""
    B, C = x.shape[0], x.shape[1]
    S = 1
    for d in x.shape[2:]:
        S *= d
    if S == 0:
        raise ValueError("GlobalAveragePooling got an empty spatial extent")

    xf = x.reshape(B, C, S)          # contiguous collapse, no data movement

    itemsize = jnp.dtype(x.dtype).itemsize

    # Channel tile: lane-dense (multiple of 128) for the output when C allows,
    # otherwise use the full channel extent (block == full dim is always legal).
    if C % 128 == 0:
        ct = min(C, 512)
    elif C <= 512:
        ct = C
    else:
        ct = 128                      # remainder blocks padded; axis is parallel, so safe

    # Batch tile: target ~4 MiB per input block so the double-buffered pipeline
    # fits comfortably inside v7x's 32 MiB default scoped VMEM (and trivially
    # inside v5e/v6e), while keeping each grid step large.
    budget = 4 * 1024 * 1024
    rows = max(1, budget // max(1, ct * S * itemsize))
    if rows >= B or B <= 8:
        bt = B                        # block == full batch dim
    else:
        bt = max(8, (rows // 8) * 8)  # multiple of 8 (output sublane constraint)

    grid = (pl.cdiv(B, bt), pl.cdiv(C, ct))

    kernel = functools.partial(_gap_kernel, inv_spatial=1.0 / float(S))

    return pl.pallas_call(
        kernel,
        out_shape=jax.ShapeDtypeStruct((B, C), x.dtype),
        grid_spec=pltpu.PrefetchScalarGridSpec(
            num_scalar_prefetch=0,
            grid=grid,
            in_specs=[pl.BlockSpec((bt, ct, S), lambda bi, ci: (bi, ci, 0))],
            out_specs=pl.BlockSpec((bt, ct), lambda bi, ci: (bi, ci)),
        ),
        compiler_params=pltpu.CompilerParams(
            dimension_semantics=("parallel", "parallel")),
    )(xf)


def global_average_pooling(inputs):
    """JAX/Pallas equivalent of GlobalAveragePooling.forward."""
    if isinstance(inputs, (tuple, list)):
        return tuple(_gap_single(x) for x in inputs)
    return _gap_single(inputs)


def _reference(inputs):
    if isinstance(inputs, (tuple, list)):
        return tuple(_reference(x) for x in inputs)
    B = inputs.shape[0]
    axes = tuple(range(2, inputs.ndim))
    return jnp.mean(inputs, axis=axes).reshape(B, -1)


if __name__ == "__main__":
    key = jax.random.PRNGKey(0)
    k1, k2, k3 = jax.random.split(key, 3)

    # dim=2 (NCHW) single-tensor path.
    x = jax.random.normal(k1, (2, 4, 16, 16), dtype=jnp.float32)
    out = jax.block_until_ready(global_average_pooling(x))
    ref = _reference(x)
    assert out.shape == ref.shape == (2, 4)
    assert jnp.max(jnp.abs(out - ref)) < 1e-5

    # tuple-of-feature-maps path (typical multi-stage backbone output).
    xs = (jax.random.normal(k2, (2, 32, 8, 8), dtype=jnp.float32),
          jax.random.normal(k3, (2, 64, 4, 4), dtype=jnp.float32))
    outs = jax.block_until_ready(global_average_pooling(xs))
    refs = _reference(xs)
    for o, r in zip(outs, refs):
        assert o.shape == r.shape
        assert jnp.max(jnp.abs(o - r)) < 1e-5

    # dim=1 path: (B, C, L) pooled over L.
    x1d = jax.random.normal(k1, (2, 16, 8), dtype=jnp.float32)
    out1d = jax.block_until_ready(global_average_pooling(x1d))
    ref1d = _reference(x1d)
    assert out1d.shape == ref1d.shape == (2, 16)
    assert jnp.max(jnp.abs(out1d - ref1d)) < 1e-5

    print("KERNEL_OK")
</pallas_src>

<mosaic_0001>
module attributes {stable_mosaic.version = 11 : i64} {
  func.func @_gap_kernel(%arg0: i32, %arg1: i32, %arg2: memref<2x4x256xf32, #tpu.memory_space<vmem>>, %arg3: memref<2x4xf32, #tpu.memory_space<vmem>>) attributes {dimension_semantics = [#tpu.dimension_semantics<parallel>, #tpu.dimension_semantics<parallel>], iteration_bounds = array<i64: 1, 1>, scalar_prefetch = 0 : i64, scratch_operands = 0 : i64, tpu.core_type = #tpu.core_type<tc>, window_params = [{transform_indices = @transform_0, window_bounds = array<i64: 2, 4, 256>}, {transform_indices = @transform_1, window_bounds = array<i64: 2, 4>}]} {
    %c0 = arith.constant 0 : index
    %c0_0 = arith.constant 0 : index
    %c0_1 = arith.constant 0 : index
    %0 = vector.load %arg2[%c0, %c0_0, %c0_1] : memref<2x4x256xf32, #tpu.memory_space<vmem>>, vector<2x4x256xf32>
    %cst = arith.constant dense<0.000000e+00> : vector<2x4xf32>
    %1 = vector.multi_reduction <add>, %0, %cst [2] : vector<2x4x256xf32> to vector<2x4xf32>
    %cst_2 = arith.constant 3.906250e-03 : f32
    %2 = vector.broadcast %cst_2 : f32 to vector<2x4xf32>
    %3 = arith.mulf %1, %2 : vector<2x4xf32>
    %c0_3 = arith.constant 0 : index
    %c0_4 = arith.constant 0 : index
    %4 = vector.load %arg3[%c0_3, %c0_4] : memref<2x4xf32, #tpu.memory_space<vmem>>, vector<2x4xf32>
    tpu.vector_store %arg3[%c0_3, %c0_4], %3 {strides = array<i32>} : memref<2x4xf32, #tpu.memory_space<vmem>>, vector<2x4xf32>,
    return
  }
  func.func @transform_0(%arg0: i32, %arg1: i32) -> (i32, i32, i32) {
    %c0_i32 = arith.constant 0 : i32
    %c0_i32_0 = arith.constant 0 : i32
    return %arg0, %arg1, %c0_i32 : i32, i32, i32
  }
  func.func @transform_1(%arg0: i32, %arg1: i32) -> (i32, i32) {
    %c0_i32 = arith.constant 0 : i32
    return %arg0, %arg1 : i32, i32
  }
}

</mosaic_0001>

<bundles_post_ra>
// kernel: tpu_custom_call.1
= control target key start
LH: loop header
LB: loop body
LE: loop exit
PB: predicated region body
PF: predicated region fallthrough
CT: control target
= control target key end

     0   :  { %6 = vsyncpa [#allocation3], 0  ;;  %s168_s0 = inlined_call_operand.hbm [shape: f32[2,4,256], index: 0, kind: input, shape index: {}]   ;;  %s169_s1 = inlined_call_operand.hbm [shape: f32[2,4], index: 1, kind: output, shape index: {}]  }
   0x1   :  { %7 = vsyncpa [#allocation4], 0  ;;  %s130_s6 = smov [#allocation2]   ;;  %s82_s10 = scalar_lea.hbm %s168_s0, 256 }
   0x2   :  { %s13_s7 = sshll.u32 %s130_s6, 4  ;;  %p83_p0 = scmp.ne.s32.totalorder %s168_s0, %s82_s10  ;;  %s14_s7 = int_to_ptr.vmem [resolvable:$true] %s13_s7 }
   0x3   :  { %p86_p1 = scmp.lt.u32.totalorder %s82_s10, %s168_s0 }
   0x5   :  { %p88_p2 = pnand %p86_p1, %p83_p0 }
   0x7   :  { %91 = shalt.err (!%p88_p2)
}
   0x8   :  { %s92_s15 = scalar_lea.vmem %s14_s7, 256  ;;  %p97_p4 = scmp.lt.s32.totalorder %s14_s7, %s14_s7 }
   0x9   :  { %p93_p3 = scmp.ne.s32.totalorder %s14_s7, %s92_s15  ;;  %p98_p5 = scmp.lt.s32.totalorder %s92_s15, %s92_s15 }
   0xb   :  { %p99_p6 = por %p98_p5, %p97_p4 }
   0xd   :  { %p100_p7 = pnand %p99_p6, %p93_p3 }
   0xf   :  { %103 = shalt.err (!%p100_p7)
}
  0x10   :  { %s131_s16 = smov 128   ;;  %s132_s17 = smov 8  }
  0x11   :  { %19 = dma.hbm_to_vmem [thread:$0]  %s168_s0, 256, %s14_s7, [#allocation3], %s131_s16, %s131_s16, %s132_s17  }
  0x12   :  { %126 = dma.done.wait [#allocation3], 256  }
  0x13   :  { %127 = vsyncadd [#allocation3], 4294967040  ;;  %vm31_vm0 = vcmask 1043456   ;;  %v23_v0 = vld [vmem:[#allocation2] sm:$0xff]  ;;  %v24_v1 = vld [vmem:[#allocation2 + $0x8] sm:$0xff]  ;;  %v46_v10 = vlaneseq  ;;  %s133_s0 = smov [#allocation5]  }
  0x14   :  { %v27_v2 = vcombine.high %v23_v0, %v23_v0  ;;  %v32_v3 = vsel %vm31_vm0, %v23_v0, 0.0  ;;  %v28_v4 = vcombine.high %v24_v1, %v24_v1  ;;  %v37_v6 = vsel %vm31_vm0, %v24_v1, 0.0  ;;  %s67_s20 = sshll.u32 %s133_s0, 4  ;;  %s68_s20 = int_to_ptr.vmem [resolvable:$true] %s67_s20 }
  0x15   :  { %v47_v11 = vand.u32 127, %v46_v10  ;;  %v49_v12 = vshrl.u32 %v46_v10, 7  ;;  %vm56_vm1 = vcmask 1041409   ;;  %vm59_vm2 = vcmask 25600   ;;  %s104_s21 = scalar_lea.vmem %s68_s20, 32  ;;  %p109_p9 = scmp.lt.s32.totalorder %s68_s20, %s68_s20 }
  0x16   :  { %v33_v5 = vsel %vm31_vm0, %v27_v2, 0.0  ;;  %v38_v7 = vsel %vm31_vm0, %v28_v4, 0.0  ;;  %p105_p8 = scmp.ne.s32.totalorder %s68_s20, %s104_s21  ;;  %p110_p10 = scmp.lt.s32.totalorder %s104_s21, %s104_s21 }
  0x17   :  { %v34_v8 = vadd.f32 %v33_v5, %v32_v3  ;;  %v39_v9 = vadd.f32 %v38_v7, %v37_v6  ;;  %v50_v14 = vsub.s32 %v47_v11, %v49_v12 }
  0x18   :  { %p111_p11 = por %p110_p10, %p109_p9 }
  0x19   :  { %35 = vadd.xlane.f32.xlu0 %v34_v8 }
  0x1a   :  { %p112_p12 = pnand %p111_p11, %p105_p8 }
  0x1d   :  { %40 = vadd.xlane.f32.xlu0 %v39_v9 }
  0xa6   :  { %v36_v13 = vpop.xlane.xlu0 %35 }
  0xa7   :  { %v42_v15 = vmul.f32 0.00390625, %v36_v13 }
  0xa9   :  { %v51_v18 = vrot.slane %v42_v15, %v50_v14 }
  0xaa   :  { %v41_v16 = vpop.xlane.xlu0 %40 }
  0xab   :  { %v43_v17 = vmul.f32 0.00390625, %v41_v16 }
  0xad   :  { %v55_v19 = vrot.slane %v43_v17, %v50_v14 }
  0xaf   :  { %v57_v20 = vsel %vm56_vm1, %v55_v19, %v51_v18 }
  0xb0   :  { %60 = vst.msk [vmem:[#allocation5] sm:$0x3] %vm59_vm2, %v57_v20 }
  0xb1   :  { %115 = shalt.err (!%p112_p12)
}
  0xb2   :  { %s116_s24 = scalar_lea.hbm %s169_s1, 32 }
  0xb3   :  { %p117_p13 = scmp.ne.s32.totalorder %s169_s1, %s116_s24  ;;  %p120_p0 = scmp.lt.u32.totalorder %s116_s24, %s169_s1 }
  0xb5   :  { %p122_p1 = pnand %p120_p0, %p117_p13 }
  0xb7   :  { %125 = shalt.err (!%p122_p1)
}
  0xb8   :  { %70 = dma.vmem_to_hbm [thread:$0]  %s68_s20, 32, %s169_s1, [#allocation4]  }
  0xb9   :  { %128 = dma.done.wait [#allocation4], 32  }
  0xba   :  { %129 = vsyncadd [#allocation4], 4294967264 }
  0xbb   :  { %74 = vsyncpa [#allocation3], 1 }
  0xbc   :  { %75 = vsyncpa [#allocation4], 1 }

</bundles_post_ra>
